<compile_context>
chip_gen: v6e
topology: v6e:2x2x1
jax: 0.10.0
libtpu: 0.0.40
codegen_flags: <defaults>
</compile_context>

<pallas_src>
import jax
import jax.numpy as jnp
from jax.experimental import pallas as pl
from jax.experimental.pallas import tpu as pltpu

VOCAB = 10003
D_EMB = 300
D_PAD = 384            # 3 * 128 lanes
K = 7
PAD = K // 2
H1 = 128
H2 = 32
OUT = 2
H_PAD = 128            # padded hidden/class width (lane-dense)


def net3_kernel(y_ref, wf_ref, bf_ref, w2_ref, b2_ref, w3_ref, b3_ref, out_ref):
    # y_ref : (Bt, K*Dp)   bf16  pre-reduced [s_full, 3 first rows, 3 last rows] / L
    # wf_ref: (K*Dp, H1)   bf16  conv taps folded with fc1, edge corrections pre-combined
    # bf_ref: (1, H1)      f32   conv bias folded with fc1 bias
    # w2_ref: (H1, Hp) bf16, b2_ref: (1, Hp) f32
    # w3_ref: (Hp, Hp) bf16, b3_ref: (1, Hp) f32
    # out_ref: (Bt, Hp)    f32   softmax probs (class lanes >= OUT are ~zero)
    h1 = jnp.dot(y_ref[...], wf_ref[...],
                 preferred_element_type=jnp.float32) + bf_ref[...]
    h1 = jnp.maximum(h1, 0.0)                                   # (Bt, 128)

    h2 = jnp.dot(h1.astype(jnp.bfloat16), w2_ref[...],
                 preferred_element_type=jnp.float32) + b2_ref[...]
    h2 = jnp.maximum(h2, 0.0)                                   # (Bt, 128) lanes>=32 are 0

    logits = jnp.dot(h2.astype(jnp.bfloat16), w3_ref[...],
                     preferred_element_type=jnp.float32) + b3_ref[...]

    # mask padded class lanes, then a lane-dense numerically-stable softmax
    cls = jax.lax.broadcasted_iota(jnp.int32, logits.shape, 1)
    logits = jnp.where(cls < OUT, logits, -1e30)
    logits = logits - jnp.max(logits, axis=-1, keepdims=True)
    e = jnp.exp(logits)
    denom = jnp.sum(e, axis=-1, keepdims=True)
    out_ref[...] = e * pl.reciprocal(denom, approx=True)


def init_params(key):
    """PyTorch-like initialization of the original (unfolded, unpadded) params."""
    ks = jax.random.split(key, 9)
    emb_w = jax.random.normal(ks[0], (VOCAB, D_EMB), jnp.float32)
    emb_w = emb_w.at[0].set(0.0)                          # padding_idx=0
    lim_c = 1.0 / (D_EMB * K) ** 0.5
    # conv_w[t, cin, cout] == torch_conv.weight[cout, cin, t]
    conv_w = jax.random.uniform(ks[1], (K, D_EMB, D_EMB), jnp.float32, -lim_c, lim_c)
    conv_b = jax.random.uniform(ks[2], (1, D_EMB), jnp.float32, -lim_c, lim_c)

    def lin(kw, kb, din, dout):
        lim = 1.0 / din ** 0.5
        w = jax.random.uniform(kw, (din, dout), jnp.float32, -lim, lim)
        b = jax.random.uniform(kb, (1, dout), jnp.float32, -lim, lim)
        return w, b

    w1, b1 = lin(ks[3], ks[4], D_EMB, H1)
    w2, b2 = lin(ks[5], ks[6], H1, H2)
    w3, b3 = lin(ks[7], ks[8], H2, OUT)
    return emb_w, conv_w, conv_b, w1, b1, w2, b2, w3, b3


def prepare_params(params):
    """One-time prep: fold conv+mean+fc1, pre-combine edge-correction weights,
    pad channels/hidden to lane multiples, cast MXU operands to bf16."""
    emb_w, conv_w, conv_b, w1, b1, w2, b2, w3, b3 = params

    emb_p = jnp.zeros((VOCAB, D_PAD), jnp.bfloat16)
    emb_p = emb_p.at[:, :D_EMB].set(emb_w.astype(jnp.bfloat16))

    # wf[t, cin, h] = sum_cout conv_w[t, cin, cout] * w1[cout, h]
    wf = jnp.einsum('tio,oh->tih', conv_w, w1)                  # (K, 300, 128) f32
    # Row order must match y = [s_full, x_0, x_1, x_2, x_{L-3}, x_{L-2}, x_{L-1}]:
    #   window_t (of the zero-'same'-padded sequence) = s_full minus the rows
    #   that shifted window misses; fold those subtractions into the weights.
    comb = jnp.stack([
        jnp.sum(wf, axis=0),            # s_full   : all 7 taps
        -(wf[4] + wf[5] + wf[6]),       # x_0      : missed by taps 4,5,6
        -(wf[5] + wf[6]),               # x_1      : missed by taps 5,6
        -wf[6],                         # x_2      : missed by tap  6
        -wf[0],                         # x_{L-3}  : missed by tap  0
        -(wf[0] + wf[1]),               # x_{L-2}  : missed by taps 0,1
        -(wf[0] + wf[1] + wf[2]),       # x_{L-1}  : missed by taps 0,1,2
    ], axis=0)                                                  # (K, 300, 128) f32
    comb_p = jnp.zeros((K, D_PAD, H1), jnp.float32).at[:, :D_EMB, :].set(comb)
    wf_p = comb_p.reshape(K * D_PAD, H1).astype(jnp.bfloat16)   # (2688, 128)
    bf = conv_b @ w1 + b1                                       # (1, 128) f32

    w2_p = jnp.zeros((H1, H_PAD), jnp.float32).at[:, :H2].set(w2).astype(jnp.bfloat16)
    b2_p = jnp.zeros((1, H_PAD), jnp.float32).at[:, :H2].set(b2)
    w3_p = jnp.zeros((H_PAD, H_PAD), jnp.float32).at[:H2, :OUT].set(w3).astype(jnp.bfloat16)
    b3_p = jnp.zeros((1, H_PAD), jnp.float32).at[:, :OUT].set(b3)
    return emb_p, wf_p, bf, w2_p, b2_p, w3_p, b3_p


def _batch_tile(B):
    # Each pre-reduced activation row is only K*D_PAD*2 B = 5.25 KiB of bf16,
    # so a 512-row tile is ~2.7 MiB: comfortably triple-buffered inside the
    # 48 MiB VMEM budget on every generation (incl. v7x's 64 MiB/TC) while
    # filling the MXU rows and amortizing the ~0.35 us per-grid-step cost.
    if B <= 512:
        return B                      # single block (block dims == full dims)
    n_blocks = -(-B // 512)           # balance blocks to minimize batch padding
    bt = -(-B // n_blocks)
    return -(-bt // 8) * 8            # multiple of 8 -> valid sublane tiling


@jax.jit
def net3_forward(token_ids, prep):
    emb_p, wf_p, bf, w2_p, b2_p, w3_p, b3_p = prep
    B, L = token_ids.shape
    if L < 4:
        raise ValueError("net3_forward requires sequence length >= 4")

    # --- plain-JAX glue: gather + pre-reduce (fuses in XLA; f32 accumulation) ---
    x = jnp.take(emb_p, token_ids, axis=0)                    # (B, L, 384) bf16
    s_full = jnp.sum(x, axis=1, dtype=jnp.float32)            # (B, 384) f32
    edges = jnp.concatenate([x[:, :PAD, :], x[:, L - PAD:, :]],
                            axis=1).astype(jnp.float32)       # (B, 6, 384)
    y = jnp.concatenate([s_full[:, None, :], edges], axis=1) * (1.0 / L)
    y = y.reshape(B, K * D_PAD).astype(jnp.bfloat16)          # (B, 2688) bf16

    bt = _batch_tile(B)
    bp = ((B + bt - 1) // bt) * bt
    if bp != B:
        y = jnp.pad(y, ((0, bp - B), (0, 0)))
    grid_steps = bp // bt

    x_spec = pl.BlockSpec((bt, K * D_PAD), lambda i: (i, 0))
    if grid_steps > 1:
        # deeper pipelining only pays (and only exists) with multiple steps
        x_spec = pl.BlockSpec((bt, K * D_PAD), lambda i: (i, 0),
                              pipeline_mode=pl.Buffered(3))
    const = lambda i: (0, 0)

    out = pl.pallas_call(
        net3_kernel,
        out_shape=jax.ShapeDtypeStruct((bp, H_PAD), jnp.float32),
        grid_spec=pltpu.PrefetchScalarGridSpec(
            num_scalar_prefetch=0,
            grid=(grid_steps,),
            in_specs=[
                x_spec,                                        # activations
                pl.BlockSpec((K * D_PAD, H1), const),          # folded conv+fc1
                pl.BlockSpec((1, H1), const),
                pl.BlockSpec((H1, H_PAD), const),
                pl.BlockSpec((1, H_PAD), const),
                pl.BlockSpec((H_PAD, H_PAD), const),
                pl.BlockSpec((1, H_PAD), const),
            ],
            out_specs=pl.BlockSpec((bt, H_PAD), lambda i: (i, 0)),
        ),
        compiler_params=pltpu.CompilerParams(
            dimension_semantics=("parallel",),
            vmem_limit_bytes=48 * 1024 * 1024),
    )(y, wf_p, bf, w2_p, b2_p, w3_p, b3_p)
    return out[:B, :OUT]


def net3_reference(token_ids, params):
    """Pure-JAX f32 reference with the original (unfolded) math."""
    emb_w, conv_w, conv_b, w1, b1, w2, b2, w3, b3 = params
    x = emb_w[token_ids]                                       # (B, L, 300)
    L = x.shape[1]
    xp = jnp.pad(x, ((0, 0), (PAD, PAD), (0, 0)))
    conv = sum(jnp.einsum('bld,do->blo', xp[:, t:t + L, :], conv_w[t])
               for t in range(K)) + conv_b
    pooled = jnp.mean(conv, axis=1)
    h1 = jax.nn.relu(pooled @ w1 + b1)
    h2 = jax.nn.relu(h1 @ w2 + b2)
    return jax.nn.softmax(h2 @ w3 + b3, axis=-1)


if __name__ == "__main__":
    key = jax.random.PRNGKey(0)
    pkey, xkey = jax.random.split(key)
    params = init_params(pkey)
    prep = prepare_params(params)

    B, L = 2, 8
    token_ids = jax.random.randint(xkey, (B, L), 0, VOCAB, dtype=jnp.int32)

    out = net3_forward(token_ids, prep)
    out = jax.block_until_ready(out)
    ref = net3_reference(token_ids, params)

    assert out.shape == (B, OUT)
    assert bool(jnp.all(jnp.isfinite(out)))
    # approx (EUP) reciprocal in the softmax -> slightly loosened row-sum check
    assert jnp.allclose(jnp.sum(out, axis=-1), 1.0, atol=2e-3)
    # bf16 activations/weights vs f32 reference -> loosened tolerance
    assert jnp.allclose(out, ref, rtol=2e-2, atol=2e-2), (out, ref)
    print("KERNEL_OK")
</pallas_src>

<mosaic_0001>
module attributes {stable_mosaic.version = 11 : i64} {
  func.func @net3_kernel(%arg0: i32, %arg1: memref<2x2688xbf16, #tpu.memory_space<vmem>>, %arg2: memref<2688x128xbf16, #tpu.memory_space<vmem>>, %arg3: memref<1x128xf32, #tpu.memory_space<vmem>>, %arg4: memref<128x128xbf16, #tpu.memory_space<vmem>>, %arg5: memref<1x128xf32, #tpu.memory_space<vmem>>, %arg6: memref<128x128xbf16, #tpu.memory_space<vmem>>, %arg7: memref<1x128xf32, #tpu.memory_space<vmem>>, %arg8: memref<2x128xf32, #tpu.memory_space<vmem>>) attributes {dimension_semantics = [#tpu.dimension_semantics<parallel>], iteration_bounds = array<i64: 1>, scalar_prefetch = 0 : i64, scratch_operands = 0 : i64, tpu.core_type = #tpu.core_type<tc>, window_params = [{transform_indices = @transform_0, window_bounds = array<i64: 2, 2688>}, {pipeline_mode = #tpu.pipeline_mode<synchronous>, transform_indices = @transform_1, window_bounds = array<i64: 2688, 128>}, {pipeline_mode = #tpu.pipeline_mode<synchronous>, transform_indices = @transform_2, window_bounds = array<i64: 1, 128>}, {pipeline_mode = #tpu.pipeline_mode<synchronous>, transform_indices = @transform_3, window_bounds = array<i64: 128, 128>}, {pipeline_mode = #tpu.pipeline_mode<synchronous>, transform_indices = @transform_4, window_bounds = array<i64: 1, 128>}, {pipeline_mode = #tpu.pipeline_mode<synchronous>, transform_indices = @transform_5, window_bounds = array<i64: 128, 128>}, {pipeline_mode = #tpu.pipeline_mode<synchronous>, transform_indices = @transform_6, window_bounds = array<i64: 1, 128>}, {transform_indices = @transform_7, window_bounds = array<i64: 2, 128>}]} {
    %c0 = arith.constant 0 : index
    %c0_0 = arith.constant 0 : index
    %0 = vector.load %arg1[%c0, %c0_0] : memref<2x2688xbf16, #tpu.memory_space<vmem>>, vector<2x2688xbf16>
    %c0_1 = arith.constant 0 : index
    %c0_2 = arith.constant 0 : index
    %1 = vector.load %arg2[%c0_1, %c0_2] : memref<2688x128xbf16, #tpu.memory_space<vmem>>, vector<2688x128xbf16>
    %cst = arith.constant dense<0.000000e+00> : vector<2x128xf32>
    %2 = tpu.matmul %0, %1, %cst {dimension_numbers = #tpu.dot_dimension_numbers<[1], [0], [0], [1], [0, 0, 1, 1], [], []>} : vector<2x2688xbf16>, vector<2688x128xbf16>, vector<2x128xf32> -> vector<2x128xf32>
    %c0_3 = arith.constant 0 : index
    %c0_4 = arith.constant 0 : index
    %3 = vector.load %arg3[%c0_3, %c0_4] : memref<1x128xf32, #tpu.memory_space<vmem>>, vector<1x128xf32>
    %4 = vector.broadcast %3 : vector<1x128xf32> to vector<2x128xf32>
    %5 = arith.addf %2, %4 : vector<2x128xf32>
    %cst_5 = arith.constant 0.000000e+00 : f32
    %6 = vector.broadcast %cst_5 : f32 to vector<2x128xf32>
    %7 = arith.maximumf %5, %6 : vector<2x128xf32>
    %8 = arith.truncf %7 : vector<2x128xf32> to vector<2x128xbf16>
    %c0_6 = arith.constant 0 : index
    %c0_7 = arith.constant 0 : index
    %9 = vector.load %arg4[%c0_6, %c0_7] : memref<128x128xbf16, #tpu.memory_space<vmem>>, vector<128x128xbf16>
    %cst_8 = arith.constant dense<0.000000e+00> : vector<2x128xf32>
    %10 = tpu.matmul %8, %9, %cst_8 {dimension_numbers = #tpu.dot_dimension_numbers<[1], [0], [0], [1], [0, 0, 1, 1], [], []>} : vector<2x128xbf16>, vector<128x128xbf16>, vector<2x128xf32> -> vector<2x128xf32>
    %c0_9 = arith.constant 0 : index
    %c0_10 = arith.constant 0 : index
    %11 = vector.load %arg5[%c0_9, %c0_10] : memref<1x128xf32, #tpu.memory_space<vmem>>, vector<1x128xf32>
    %12 = vector.broadcast %11 : vector<1x128xf32> to vector<2x128xf32>
    %13 = arith.addf %10, %12 : vector<2x128xf32>
    %cst_11 = arith.constant 0.000000e+00 : f32
    %14 = vector.broadcast %cst_11 : f32 to vector<2x128xf32>
    %15 = arith.maximumf %13, %14 : vector<2x128xf32>
    %16 = arith.truncf %15 : vector<2x128xf32> to vector<2x128xbf16>
    %c0_12 = arith.constant 0 : index
    %c0_13 = arith.constant 0 : index
    %17 = vector.load %arg6[%c0_12, %c0_13] : memref<128x128xbf16, #tpu.memory_space<vmem>>, vector<128x128xbf16>
    %cst_14 = arith.constant dense<0.000000e+00> : vector<2x128xf32>
    %18 = tpu.matmul %16, %17, %cst_14 {dimension_numbers = #tpu.dot_dimension_numbers<[1], [0], [0], [1], [0, 0, 1, 1], [], []>} : vector<2x128xbf16>, vector<128x128xbf16>, vector<2x128xf32> -> vector<2x128xf32>
    %c0_15 = arith.constant 0 : index
    %c0_16 = arith.constant 0 : index
    %19 = vector.load %arg7[%c0_15, %c0_16] : memref<1x128xf32, #tpu.memory_space<vmem>>, vector<1x128xf32>
    %20 = vector.broadcast %19 : vector<1x128xf32> to vector<2x128xf32>
    %21 = arith.addf %18, %20 : vector<2x128xf32>
    %22 = tpu.iota {dimensions = array<i32: 1>} : vector<2x128xi32>
    %c2_i32 = arith.constant 2 : i32
    %23 = vector.broadcast %c2_i32 : i32 to vector<2x128xi32>
    %24 = arith.cmpi slt, %22, %23 : vector<2x128xi32>
    %cst_17 = arith.constant -1.000000e+30 : f32
    %25 = vector.broadcast %cst_17 : f32 to vector<2x128xf32>
    %26 = arith.select %24, %21, %25 : vector<2x128xi1>, vector<2x128xf32>
    %cst_18 = arith.constant dense<0xFF800000> : vector<2xf32>
    %27 = vector.multi_reduction <maximumf>, %26, %cst_18 [1] : vector<2x128xf32> to vector<2xf32>
    %28 = vector.shape_cast %27 : vector<2xf32> to vector<2x1xf32>
    %29 = vector.broadcast %28 : vector<2x1xf32> to vector<2x128xf32>
    %30 = arith.subf %26, %29 : vector<2x128xf32>
    %31 = math.exp %30 : vector<2x128xf32>
    %cst_19 = arith.constant dense<0.000000e+00> : vector<2xf32>
    %32 = vector.multi_reduction <add>, %31, %cst_19 [1] : vector<2x128xf32> to vector<2xf32>
    %33 = vector.shape_cast %32 : vector<2xf32> to vector<2x1xf32>
    %34 = tpu.reciprocal %33 {approx = true} : vector<2x1xf32> -> vector<2x1xf32>
    %35 = vector.broadcast %34 : vector<2x1xf32> to vector<2x128xf32>
    %36 = arith.mulf %31, %35 : vector<2x128xf32>
    %c0_20 = arith.constant 0 : index
    %c0_21 = arith.constant 0 : index
    %37 = vector.load %arg8[%c0_20, %c0_21] : memref<2x128xf32, #tpu.memory_space<vmem>>, vector<2x128xf32>
    tpu.vector_store %arg8[%c0_20, %c0_21], %36 {strides = array<i32>} : memref<2x128xf32, #tpu.memory_space<vmem>>, vector<2x128xf32>,
    return
  }
  func.func @transform_0(%arg0: i32) -> (i32, i32) {
    %c0_i32 = arith.constant 0 : i32
    %c0_i32_0 = arith.constant 0 : i32
    return %arg0, %c0_i32 : i32, i32
  }
  func.func @transform_1(%arg0: i32) -> (i32, i32) {
    %c0_i32 = arith.constant 0 : i32
    %c0_i32_0 = arith.constant 0 : i32
    %c0_i32_1 = arith.constant 0 : i32
    return %c0_i32, %c0_i32_0 : i32, i32
  }
  func.func @transform_2(%arg0: i32) -> (i32, i32) {
    %c0_i32 = arith.constant 0 : i32
    %c0_i32_0 = arith.constant 0 : i32
    %c0_i32_1 = arith.constant 0 : i32
    return %c0_i32, %c0_i32_0 : i32, i32
  }
  func.func @transform_3(%arg0: i32) -> (i32, i32) {
    %c0_i32 = arith.constant 0 : i32
    %c0_i32_0 = arith.constant 0 : i32
    %c0_i32_1 = arith.constant 0 : i32
    return %c0_i32, %c0_i32_0 : i32, i32
  }
  func.func @transform_4(%arg0: i32) -> (i32, i32) {
    %c0_i32 = arith.constant 0 : i32
    %c0_i32_0 = arith.constant 0 : i32
    %c0_i32_1 = arith.constant 0 : i32
    return %c0_i32, %c0_i32_0 : i32, i32
  }
  func.func @transform_5(%arg0: i32) -> (i32, i32) {
    %c0_i32 = arith.constant 0 : i32
    %c0_i32_0 = arith.constant 0 : i32
    %c0_i32_1 = arith.constant 0 : i32
    return %c0_i32, %c0_i32_0 : i32, i32
  }
  func.func @transform_6(%arg0: i32) -> (i32, i32) {
    %c0_i32 = arith.constant 0 : i32
    %c0_i32_0 = arith.constant 0 : i32
    %c0_i32_1 = arith.constant 0 : i32
    return %c0_i32, %c0_i32_0 : i32, i32
  }
  func.func @transform_7(%arg0: i32) -> (i32, i32) {
    %c0_i32 = arith.constant 0 : i32
    %c0_i32_0 = arith.constant 0 : i32
    return %arg0, %c0_i32 : i32, i32
  }
}

</mosaic_0001>

<bundles_post_ra>
// kernel: net3_forward.1
= control target key start
LH: loop header
LB: loop body
LE: loop exit
PB: predicated region body
PF: predicated region fallthrough
CT: control target
= control target key end

     0   :  { %12 = vsyncpa [#allocation3], 0  ;;  %s3310_s0 = inlined_call_operand.vmem [shape: bf16[2,2688], index: 0, kind: input, shape index: {}]   ;;  %s3311_s1 = inlined_call_operand.hbm [shape: bf16[2688,128], index: 1, kind: input, shape index: {}]   ;;  %s3312_s2 = inlined_call_operand.hbm [shape: f32[1,128], index: 2, kind: input, shape index: {}]   ;;  %s3313_s3 = inlined_call_operand.hbm [shape: bf16[128,128], index: 3, kind: input, shape index: {}]   ;;  %s3314_s4 = inlined_call_operand.hbm [shape: f32[1,128], index: 4, kind: input, shape index: {}]   ;;  %s3315_s5 = inlined_call_operand.hbm [shape: bf16[128,128], index: 5, kind: input, shape index: {}]   ;;  %s3316_s6 = inlined_call_operand.hbm [shape: f32[1,128], index: 6, kind: input, shape index: {}]   ;;  %s3317_s7 = inlined_call_operand.hbm [shape: f32[2,128], index: 7, kind: output, shape index: {}]  }
   0x1   :  { %13 = vsyncpa [#allocation6], 0 }
   0x2   :  { %14 = vsyncpa [#allocation9], 0 }
   0x3   :  { %15 = vsyncpa [#allocation12], 0 }
   0x4   :  { %16 = vsyncpa [#allocation4], 0  ;;  %s3167_s24 = smov [#allocation5]   ;;  %s3168_s26 = smov [#allocation8]  }
   0x5   :  { %s37_s25 = sshll.u32 %s3167_s24, 4  ;;  %s59_s27 = sshll.u32 %s3168_s26, 4  ;;  %s38_s25 = int_to_ptr.vmem [resolvable:$true] %s37_s25  ;;  %s60_s27 = int_to_ptr.vmem [resolvable:$true] %s59_s27 }
   0x6   :  { %s3025_s28 = scalar_lea.vmem %s38_s25, 16  ;;  %s3029_s29 = scalar_lea.vmem %s38_s25, 32 }
   0x7   :  { %p3026_p0 = scmp.ne.s32.totalorder %s38_s25, %s3025_s28  ;;  %p3030_p1 = scmp.lt.s32.totalorder %s38_s25, %s38_s25 }
   0x8   :  { %p3031_p2 = scmp.lt.s32.totalorder %s3029_s29, %s3025_s28 }
   0xa   :  { %p3032_p3 = por %p3031_p2, %p3030_p1 }
   0xc   :  { %p3033_p4 = pnand %p3032_p3, %p3026_p0 }
   0xe   :  { %3036 = shalt.err (!%p3033_p4)
}
   0xf   :  { %40 = dma.hbm_to_vmem [thread:$0]  %s3312_s2, 16, %s38_s25, [#allocation6]  }
  0x10   :  { %s3045_s9 = scalar_lea.vmem %s60_s27, 16  ;;  %s3049_s10 = scalar_lea.vmem %s60_s27, 32 }
  0x11   :  { %p3046_p5 = scmp.ne.s32.totalorder %s60_s27, %s3045_s9  ;;  %p3050_p6 = scmp.lt.s32.totalorder %s60_s27, %s60_s27 }
  0x12   :  { %p3051_p7 = scmp.lt.s32.totalorder %s3049_s10, %s3045_s9 }
  0x14   :  { %p3052_p8 = por %p3051_p7, %p3050_p6 }
  0x16   :  { %p3053_p9 = pnand %p3052_p8, %p3046_p5 }
  0x18   :  { %3056 = shalt.err (!%p3053_p9)
}
  0x19   :  { %62 = dma.hbm_to_vmem [thread:$0]  %s3314_s4, 16, %s60_s27, [#allocation9]  }
  0x1a   :  { %s3169_s13 = smov [#allocation2]  }
  0x1b   :  { %s24_s14 = sshll.u32 %s3169_s13, 4  ;;  %s25_s14 = int_to_ptr.vmem [resolvable:$true] %s24_s14 }
  0x1c   :  { %s3065_s15 = scalar_lea.vmem %s25_s14, 21504  ;;  %p3070_p11 = scmp.lt.s32.totalorder %s25_s14, %s25_s14 }
  0x1d   :  { %p3066_p10 = scmp.ne.s32.totalorder %s25_s14, %s3065_s15  ;;  %p3071_p12 = scmp.lt.s32.totalorder %s3065_s15, %s3065_s15 }
  0x1f   :  { %p3072_p13 = por %p3071_p12, %p3070_p11 }
  0x21   :  { %p3073_p0 = pnand %p3072_p13, %p3066_p10 }
  0x23   :  { %3076 = shalt.err (!%p3073_p0)
}
  0x24   :  { %s3170_s2 = smov 64   ;;  %s3171_s16 = smov 4  }
  0x25   :  { %30 = dma.hbm_to_vmem [thread:$0]  %s3311_s1, 21504, %s25_s14, [#allocation3], %s3170_s2, %s3170_s2, %s3171_s16  }
  0x26   :  { %s3172_s19 = smov [#allocation7]   ;;  %s3173_s4 = smov [#allocation10]  }
  0x27   :  { %s46_s20 = sshll.u32 %s3172_s19, 4  ;;  %s68_s21 = sshll.u32 %s3173_s4, 4  ;;  %s47_s20 = int_to_ptr.vmem [resolvable:$true] %s46_s20  ;;  %s69_s21 = int_to_ptr.vmem [resolvable:$true] %s68_s21 }
  0x28   :  { %s3085_s22 = scalar_lea.vmem %s47_s20, 1024  ;;  %p3090_p2 = scmp.lt.s32.totalorder %s47_s20, %s47_s20 }
  0x29   :  { %p3086_p1 = scmp.ne.s32.totalorder %s47_s20, %s3085_s22  ;;  %p3091_p3 = scmp.lt.s32.totalorder %s3085_s22, %s3085_s22 }
  0x2b   :  { %p3092_p4 = por %p3091_p3, %p3090_p2 }
  0x2d   :  { %p3093_p5 = pnand %p3092_p4, %p3086_p1 }
  0x2f   :  { %3096 = shalt.err (!%p3093_p5)
}
  0x30   :  { %52 = dma.hbm_to_vmem [thread:$0]  %s3313_s3, 1024, %s47_s20, [#allocation6], %s3170_s2, %s3170_s2, %s3171_s16  }
  0x31   :  { %s3105_s25 = scalar_lea.vmem %s69_s21, 1024  ;;  %p3110_p7 = scmp.lt.s32.totalorder %s69_s21, %s69_s21 }
  0x32   :  { %p3106_p6 = scmp.ne.s32.totalorder %s69_s21, %s3105_s25  ;;  %p3111_p8 = scmp.lt.s32.totalorder %s3105_s25, %s3105_s25 }
  0x34   :  { %p3112_p9 = por %p3111_p8, %p3110_p7 }
  0x36   :  { %p3113_p10 = pnand %p3112_p9, %p3106_p6 }
  0x38   :  { %3116 = shalt.err (!%p3113_p10)
}
  0x39   :  { %74 = dma.hbm_to_vmem [thread:$0]  %s3315_s5, 1024, %s69_s21, [#allocation9], %s3170_s2, %s3170_s2, %s3171_s16  }
  0x3a   :  { %s3174_s27 = smov [#allocation11]  }
  0x3b   :  { %s81_s28 = sshll.u32 %s3174_s27, 4  ;;  %s82_s28 = int_to_ptr.vmem [resolvable:$true] %s81_s28 }
  0x3c   :  { %s3125_s29 = scalar_lea.vmem %s82_s28, 16  ;;  %s3129_s30 = scalar_lea.vmem %s82_s28, 32 }
  0x3d   :  { %p3126_p11 = scmp.ne.s32.totalorder %s82_s28, %s3125_s29  ;;  %p3130_p12 = scmp.lt.s32.totalorder %s82_s28, %s82_s28 }
  0x3e   :  { %p3131_p13 = scmp.lt.s32.totalorder %s3129_s30, %s3125_s29 }
  0x40   :  { %p3132_p0 = por %p3131_p13, %p3130_p12 }
  0x42   :  { %p3133_p1 = pnand %p3132_p0, %p3126_p11 }
  0x44   :  { %3136 = shalt.err (!%p3133_p1)
}
  0x45   :  { %84 = dma.hbm_to_vmem [thread:$0]  %s3316_s6, 16, %s82_s28, [#allocation12]  }
  0x46   :  { %3157 = dma.done.wait [#allocation3], 21504  }
  0x47   :  { %3158 = vsyncadd [#allocation3], 4294945792 }
  0x48   :  { %3159 = dma.done.wait [#allocation6], 1040  }
  0x49   :  { %3160 = vsyncadd [#allocation6], 4294966256 }
  0x4a   :  { %3161 = dma.done.wait [#allocation9], 1040  }
  0x4b   :  { %3162 = vsyncadd [#allocation9], 4294966256 }
  0x4c   :  { %3163 = dma.done.wait [#allocation12], 16  }
  0x4d   :  { %3164 = vsyncadd [#allocation12], 4294967280  ;;  %v2826_v0 = vld [vmem:[#allocation2 + $0x78] sm:$0xff]   ;;  %v2830_v4 = vld [vmem:[#allocation2 + $0x70] sm:$0xff]   ;;  %v3175_v21 = vmov 1966171168   ;;  %v457_v23 = vlaneseq }
  0x4e   :  { %v2827_v1 = vld [vmem:[#allocation2 + $0x38] sm:$0xff]   ;;  %2507 = vmatprep.subr.bf16.mxu0 %v2826_v0  ;;  %v2831_v5 = vld [vmem:[#allocation2 + $0x30] sm:$0xff]   ;;  %v2834_v8 = vld [vmem:[#allocation2 + $0x68] sm:$0xff]   ;;  %v455_v22 = vunpack.c.l.s4 %v3175_v21  ;;  %vm3177_vm0 = vmmov 0   ;;  %vm2289_vm2 = vcmask 1041408  }
  0x4f   :  { %v2828_v2 = vld [vmem:[#allocation2 + $0xf8] sm:$0xff]   ;;  %2508 = vmatpush3.bf16.msra.mxu0 %v2827_v1  ;;  %v2832_v6 = vld [vmem:[#allocation2 + $0xf0] sm:$0xff]   ;;  %v2835_v9 = vld [vmem:[#allocation2 + $0x28] sm:$0xff]   ;;  %v458_v29 = vshrl.u32 %v457_v23, 7 }
  0x50   :  { %v2829_v3 = vld [vmem:[#allocation2 + $0xb8] sm:$0xff]   ;;  %2529 = vmatprep.subr.bf16.mxu1 %v2828_v2  ;;  %2509 = vmatprep.subr.bf16.mxu0 %v2830_v4  ;;  %v2833_v7 = vld [vmem:[#allocation2 + $0xb0] sm:$0xff]   ;;  %v2836_v10 = vld [vmem:[#allocation2 + $0xe8] sm:$0xff]   ;;  %v456_v28 = vunpack.c.0.s8 %v455_v22 }
  0x51   :  { %2530 = vmatpush3.bf16.msra.mxu1 %v2829_v3  ;;  %v2837_v11 = vld [vmem:[#allocation2 + $0xa8] sm:$0xff]   ;;  %v2838_v12 = vld [vmem:[#allocation2 + $0x60] sm:$0xff]   ;;  %v2842_v16 = vld [vmem:[#allocation2 + $0x58] sm:$0xff]  }
  0x52   :  { %2531 = vmatprep.subr.bf16.mxu1 %v2832_v6  ;;  %v2839_v13 = vld [vmem:[#allocation2 + $0x20] sm:$0xff]   ;;  %v2843_v17 = vld [vmem:[#allocation2 + $0x18] sm:$0xff]   ;;  %v2846_v20 = vld [vmem:[#allocation2 + $0x50] sm:$0xff]   ;;  %v3238_v34 = vsub.s32 %v456_v28, %v458_v29 }
  0x53   :  { %2510 = vmatpush3.bf16.msra.mxu0 %v2831_v5  ;;  %v2840_v14 = vld [vmem:[#allocation2 + $0xe0] sm:$0xff]   ;;  %v2844_v18 = vld [vmem:[#allocation2 + $0xd8] sm:$0xff]   ;;  %v2847_v24 = vld [vmem:[#allocation2 + $0x10] sm:$0xff]  }
  0x54   :  { %2511 = vmatprep.subr.bf16.mxu0 %v2834_v8  ;;  %v2841_v15 = vld [vmem:[#allocation2 + $0xa0] sm:$0xff]   ;;  %v2845_v19 = vld [vmem:[#allocation2 + $0x98] sm:$0xff]   ;;  %v2848_v25 = vld [vmem:[#allocation2 + $0xd0] sm:$0xff]  }
  0x55   :  { %2532 = vmatpush3.bf16.msra.mxu1 %v2833_v7  ;;  %v2849_v26 = vld [vmem:[#allocation2 + $0x90] sm:$0xff]   ;;  %v2850_v27 = vld [vmem:[#allocation2 + $0x48] sm:$0xff]   ;;  %v2854_v33 = vld [vmem:[#allocation2 + $0x40] sm:$0xff]  }
  0x56   :  { %2533 = vmatprep.subr.bf16.mxu1 %v2836_v10  ;;  %v2851_v30 = vld [vmem:[#allocation2 + $0x8] sm:$0xff]   ;;  %v2855_v35 = vld [vmem:[#allocation2] sm:$0xff]   ;;  %v2859_v41 = vld [vmem:[#allocation2 + $0x178] sm:$0xff]  }
  0x57   :  { %2512 = vmatpush3.bf16.msra.mxu0 %v2835_v9  ;;  %v2852_v31 = vld [vmem:[#allocation2 + $0xc8] sm:$0xff]   ;;  %v2856_v36 = vld [vmem:[#allocation2 + $0xc0] sm:$0xff]   ;;  %v2861_v45 = vld [vmem:[#allocation2 + $0x1f8] sm:$0xff]  }
  0x58   :  { %2513 = vmatprep.subr.bf16.mxu0 %v2838_v12  ;;  %v2853_v32 = vld [vmem:[#allocation2 + $0x88] sm:$0xff]   ;;  %v104_v37 = vld [vmem:[%s3310_s0] sm:$0xff]  ;;  %v2860_v47 = vld [vmem:[#allocation2 + $0x138] sm:$0xff]  }
  0x59   :  { %2534 = vmatpush3.bf16.msra.mxu1 %v2837_v11  ;;  %v453_v38 = vcombine.high %v104_v37, %v104_v37  ;;  %v460_v39 = vrot.slane %v104_v37, %v3238_v34  ;;  %v2858_v40 = vld [vmem:[#allocation2 + $0x80] sm:$0xff]   ;;  %v2863_v50 = vld [vmem:[#allocation2 + $0x170] sm:$0xff]   ;;  %v2862_v52 = vld [vmem:[#allocation2 + $0x1b8] sm:$0xff]  }
  0x5a   :  { %2535 = vmatprep.subr.bf16.mxu1 %v2840_v14  ;;  %v2865_v54 = vld [vmem:[#allocation2 + $0x1f0] sm:$0xff]   ;;  %v2867_v57 = vld [vmem:[#allocation2 + $0x168] sm:$0xff]   ;;  %v2871_v61 = vld [vmem:[#allocation2 + $0x160] sm:$0xff]  }
  0x5b   :  { %2514 = vmatpush3.bf16.msra.mxu0 %v2839_v13  ;;  %v468_v42 = vcombine.high %v460_v39, %v460_v39  ;;  %v476_v43 = vrot.slane %v460_v39, %v3238_v34  ;;  %v3246_v44 = vrot.slane %v453_v38, %v3238_v34  ;;  %v2864_v55 = vld [vmem:[#allocation2 + $0x130] sm:$0xff]   ;;  %v2869_v59 = vld [vmem:[#allocation2 + $0x1e8] sm:$0xff]   ;;  %v2873_v63 = vld [vmem:[#allocation2 + $0x1e0] sm:$0xff]  }
  0x5c   :  { %2515 = vmatprep.subr.bf16.mxu0 %v2842_v16  ;;  %v2866_v58 = vld [vmem:[#allocation2 + $0x1b0] sm:$0xff]   ;;  %v2868_v60 = vld [vmem:[#allocation2 + $0x128] sm:$0xff]   ;;  %v2872_v0 = vld [vmem:[#allocation2 + $0x120] sm:$0xff]  }
  0x5d   :  { %2536 = vmatpush3.bf16.msra.mxu1 %v2841_v15  ;;  %v490_v46 = vrot.slane %v468_v42, %v3238_v34  ;;  %v469_v48 = vcombine.high %v3246_v44, %v3246_v44  ;;  %v498_v49 = vcombine.high %v476_v43, %v476_v43  ;;  %v2870_v62 = vld [vmem:[#allocation2 + $0x1a8] sm:$0xff]   ;;  %v2875_v1 = vld [vmem:[#allocation2 + $0x158] sm:$0xff]   ;;  %v2874_v2 = vld [vmem:[#allocation2 + $0x1a0] sm:$0xff]  }
  0x5e   :  { %2537 = vmatprep.subr.bf16.mxu1 %v2844_v18  ;;  %v2877_v3 = vld [vmem:[#allocation2 + $0x1d8] sm:$0xff]   ;;  %v2879_v5 = vld [vmem:[#allocation2 + $0x150] sm:$0xff]   ;;  %v2883_v9 = vld [vmem:[#allocation2 + $0x148] sm:$0xff]  }
  0x5f   :  { %2516 = vmatpush3.bf16.msra.mxu0 %v2843_v17  ;;  %1651 = vmatprep.mubr.bf16.mxu0 %v490_v46  ;;  %v500_v51 = vcombine.high %v490_v46, %v490_v46  ;;  %v497_v53 = vrot.slane %v469_v48, %v3238_v34  ;;  %v2876_v4 = vld [vmem:[#allocation2 + $0x118] sm:$0xff]   ;;  %v2881_v7 = vld [vmem:[#allocation2 + $0x1d0] sm:$0xff]   ;;  %v2885_v11 = vld [vmem:[#allocation2 + $0x1c8] sm:$0xff]   ;;  %v483_v17 = vrot.slane %v3246_v44, %v3238_v34 }
  0x60   :  { %2517 = vmatprep.subr.bf16.mxu0 %v2846_v20  ;;  %v2878_v6 = vld [vmem:[#allocation2 + $0x198] sm:$0xff]   ;;  %v2880_v8 = vld [vmem:[#allocation2 + $0x110] sm:$0xff]   ;;  %v2884_v12 = vld [vmem:[#allocation2 + $0x108] sm:$0xff]  }
  0x61   :  { %2538 = vmatpush3.bf16.msra.mxu1 %v2845_v19  ;;  %1691 = vmatprep.mubr.bf16.mxu1 %v500_v51  ;;  %v501_v56 = vcombine.high %v497_v53, %v497_v53  ;;  %v2882_v10 = vld [vmem:[#allocation2 + $0x190] sm:$0xff]   ;;  %v2887_v13 = vld [vmem:[#allocation2 + $0x140] sm:$0xff]   ;;  %v2886_v14 = vld [vmem:[#allocation2 + $0x188] sm:$0xff]   ;;  %v499_v22 = vcombine.high %v483_v17, %v483_v17 }
  0x62   :  { %2539 = vmatprep.subr.bf16.mxu1 %v2848_v25  ;;  %v2889_v15 = vld [vmem:[#allocation2 + $0x1c0] sm:$0xff]   ;;  %v2891_v18 = vld [vmem:[#allocation2 + $0x278] sm:$0xff]   ;;  %v2899_v28 = vld [vmem:[#allocation2 + $0x268] sm:$0xff]  }
  0x63   :  { %2518 = vmatpush3.bf16.msra.mxu0 %v2847_v24  ;;  %v2888_v16 = vld [vmem:[#allocation2 + $0x100] sm:$0xff]   ;;  %v2893_v20 = vld [vmem:[#allocation2 + $0x2f8] sm:$0xff]   ;;  %v2895_v24 = vld [vmem:[#allocation2 + $0x270] sm:$0xff]  }
  0x64   :  { %2519 = vmatprep.subr.bf16.mxu0 %v2850_v27  ;;  %v2890_v19 = vld [vmem:[#allocation2 + $0x180] sm:$0xff]   ;;  %v2892_v21 = vld [vmem:[#allocation2 + $0x238] sm:$0xff]   ;;  %v2896_v27 = vld [vmem:[#allocation2 + $0x230] sm:$0xff]  }
  0x65   :  { %2540 = vmatpush3.bf16.msra.mxu1 %v2849_v26  ;;  %v2894_v25 = vld [vmem:[#allocation2 + $0x2b8] sm:$0xff]   ;;  %v2897_v26 = vld [vmem:[#allocation2 + $0x2f0] sm:$0xff]   ;;  %v2906_v38 = vld [vmem:[#allocation2 + $0x2a0] sm:$0xff]  }
  0x66   :  { %2541 = vmatprep.subr.bf16.mxu1 %v2852_v31  ;;  %v2898_v29 = vld [vmem:[#allocation2 + $0x2b0] sm:$0xff]   ;;  %v2900_v31 = vld [vmem:[#allocation2 + $0x228] sm:$0xff]   ;;  %v2907_v37 = vld [vmem:[#allocation2 + $0x258] sm:$0xff]  }
  0x67   :  { %2520 = vmatpush3.bf16.msra.mxu0 %v2851_v30  ;;  %v2901_v30 = vld [vmem:[#allocation2 + $0x2e8] sm:$0xff]   ;;  %v2909_v39 = vld [vmem:[#allocation2 + $0x2d8] sm:$0xff]   ;;  %v2912_v44 = vld [vmem:[#allocation2 + $0x210] sm:$0xff]  }
  0x68   :  { %2521 = vmatprep.subr.bf16.mxu0 %v2854_v33  ;;  %v2902_v33 = vld [vmem:[#allocation2 + $0x2a8] sm:$0xff]   ;;  %v2910_v42 = vld [vmem:[#allocation2 + $0x298] sm:$0xff]   ;;  %v2914_v46 = vld [vmem:[#allocation2 + $0x290] sm:$0xff]  }
  0x69   :  { %2542 = vmatpush3.bf16.msra.mxu1 %v2853_v32  ;;  %v2903_v32 = vld [vmem:[#allocation2 + $0x260] sm:$0xff]   ;;  %v2916_v48 = vld [vmem:[#allocation2 + $0x208] sm:$0xff]  }
  0x6a   :  { %2543 = vmatprep.subr.bf16.mxu1 %v2856_v36  ;;  %v2904_v36 = vld [vmem:[#allocation2 + $0x220] sm:$0xff]  }
  0x6b   :  { %2522 = vmatpush3.bf16.msra.mxu0 %v2855_v35  ;;  %v2905_v35 = vld [vmem:[#allocation2 + $0x2e0] sm:$0xff]  }
  0x6c   :  { %2551 = vmatprep.subr.bf16.mxu0 %v2859_v41  ;;  %v2911_v41 = vld [vmem:[#allocation2 + $0x250] sm:$0xff]   ;;  %v2921_v51 = vld [vmem:[#allocation2 + $0x2c0] sm:$0xff]  }
  0x6d   :  { %2544 = vmatpush3.bf16.msra.mxu1 %v2858_v40  ;;  %v2908_v40 = vld [vmem:[#allocation2 + $0x218] sm:$0xff]  }
  0x6e   :  { %2573 = vmatprep.subr.bf16.mxu1 %v2861_v45  ;;  %1652 = vmatmul.mubr.bf16.vlgmr.msra.gmra.mxu0 %v476_v43  ;;  %v2913_v43 = vld [vmem:[#allocation2 + $0x2d0] sm:$0xff]   ;;  %v2915_v45 = vld [vmem:[#allocation2 + $0x248] sm:$0xff]  }
  0x6f   :  { %2552 = vmatpush3.bf16.msra.mxu0 %v2860_v47  ;;  %1731 = vmatprep.mubr.bf16.mxu0 %v497_v53  ;;  %v2917_v47 = vld [vmem:[#allocation2 + $0x2c8] sm:$0xff]   ;;  %v2920_v53 = vld [vmem:[#allocation2 + $0x200] sm:$0xff]  }
  0x70   :  { %1692 = vmatmul.mubr.bf16.vlgmr.msra.gmra.mxu1 %v498_v49  ;;  %2553 = vmatprep.subr.bf16.mxu0 %v2863_v50  ;;  %v2919_v49 = vld [vmem:[#allocation2 + $0x240] sm:$0xff]   ;;  %v2918_v50 = vld [vmem:[#allocation2 + $0x288] sm:$0xff]  }
  0x71   :  { %2574 = vmatpush3.bf16.msra.mxu1 %v2862_v52  ;;  %1771 = vmatprep.mubr.bf16.mxu1 %v501_v56  ;;  %v105_v52 = vld [vmem:[%s3310_s0 + $0x8] sm:$0xff]  ;;  %v2923_v56 = vld [vmem:[#allocation2 + $0x378] sm:$0xff]  }
  0x72   :  { %2575 = vmatprep.subr.bf16.mxu1 %v2865_v54  ;;  %v509_v54 = vrot.slane %v105_v52, %v3238_v34 }
  0x73   :  { %2554 = vmatpush3.bf16.msra.mxu0 %v2864_v55  ;;  %v502_v55 = vcombine.high %v105_v52, %v105_v52  ;;  %v2969_v52 = vld [vmem:[#allocation2 + $0x420] sm:$0xff]  }
  0x74   :  { %2555 = vmatprep.subr.bf16.mxu0 %v2867_v57  ;;  %v517_v57 = vcombine.high %v509_v54, %v509_v54 }
  0x75   :  { %2576 = vmatpush3.bf16.msra.mxu1 %v2866_v58  ;;  %v2922_v58 = vld [vmem:[#allocation2 + $0x280] sm:$0xff]  }
  0x76   :  { %2577 = vmatprep.subr.bf16.mxu1 %v2869_v59  ;;  %v525_v59 = vrot.slane %v509_v54, %v3238_v34  ;;  %v2971_v54 = vld [vmem:[#allocation2 + $0x4a0] sm:$0xff]  }
  0x77   :  { %2556 = vmatpush3.bf16.msra.mxu0 %v2868_v60  ;;  %v3260_v60 = vrot.slane %v502_v55, %v3238_v34  ;;  %v2974_v55 = vld [vmem:[#allocation2 + $0x4d8] sm:$0xff]  }
  0x78   :  { %2557 = vmatprep.subr.bf16.mxu0 %v2871_v61  ;;  %v2925_v61 = vld [vmem:[#allocation2 + $0x3f8] sm:$0xff]  }
  0x79   :  { %2578 = vmatpush3.bf16.msra.mxu1 %v2870_v62  ;;  %v539_v62 = vrot.slane %v517_v57, %v3238_v34  ;;  %v2976_v57 = vld [vmem:[#allocation2 + $0x450] sm:$0xff]  }
  0x7a   :  { %2579 = vmatprep.subr.bf16.mxu1 %v2873_v63  ;;  %v2924_v63 = vld [vmem:[#allocation2 + $0x338] sm:$0xff]  }
  0x7b   :  { %2558 = vmatpush3.bf16.msra.mxu0 %v2872_v0  ;;  %v518_v0 = vcombine.high %v3260_v60, %v3260_v60 }
  0x7c   :  { %2559 = vmatprep.subr.bf16.mxu0 %v2875_v1  ;;  %v547_v1 = vcombine.high %v525_v59, %v525_v59 }
  0x7d   :  { %2580 = vmatpush3.bf16.msra.mxu1 %v2874_v2  ;;  %v2927_v2 = vld [vmem:[#allocation2 + $0x370] sm:$0xff]  }
  0x7e   :  { %2581 = vmatprep.subr.bf16.mxu1 %v2877_v3  ;;  %v549_v3 = vcombine.high %v539_v62, %v539_v62 }
  0x7f   :  { %2560 = vmatpush3.bf16.msra.mxu0 %v2876_v4  ;;  %v2926_v4 = vld [vmem:[#allocation2 + $0x3b8] sm:$0xff]  }
  0x80   :  { %2561 = vmatprep.subr.bf16.mxu0 %v2879_v5  ;;  %v546_v5 = vrot.slane %v518_v0, %v3238_v34  ;;  %v2981_v0 = vld [vmem:[#allocation2 + $0x408] sm:$0xff]  }
  0x81   :  { %2582 = vmatpush3.bf16.msra.mxu1 %v2878_v6  ;;  %v2929_v6 = vld [vmem:[#allocation2 + $0x3f0] sm:$0xff]  }
  0x82   :  { %2583 = vmatprep.subr.bf16.mxu1 %v2881_v7  ;;  %v2928_v7 = vld [vmem:[#allocation2 + $0x330] sm:$0xff]  }
  0x83   :  { %2562 = vmatpush3.bf16.msra.mxu0 %v2880_v8  ;;  %v550_v8 = vcombine.high %v546_v5, %v546_v5 }
  0x84   :  { %2563 = vmatprep.subr.bf16.mxu0 %v2883_v9  ;;  %v2931_v9 = vld [vmem:[#allocation2 + $0x368] sm:$0xff]  }
  0x85   :  { %2584 = vmatpush3.bf16.msra.mxu1 %v2882_v10  ;;  %v2930_v10 = vld [vmem:[#allocation2 + $0x3b0] sm:$0xff]  }
  0x86   :  { %2585 = vmatprep.subr.bf16.mxu1 %v2885_v11  ;;  %v2933_v11 = vld [vmem:[#allocation2 + $0x3e8] sm:$0xff]  }
  0x87   :  { %2564 = vmatpush3.bf16.msra.mxu0 %v2884_v12  ;;  %v2932_v12 = vld [vmem:[#allocation2 + $0x328] sm:$0xff]  }
  0x88   :  { %2565 = vmatprep.subr.bf16.mxu0 %v2887_v13  ;;  %v2935_v13 = vld [vmem:[#allocation2 + $0x360] sm:$0xff]  }
  0x89   :  { %2586 = vmatpush3.bf16.msra.mxu1 %v2886_v14  ;;  %v2934_v14 = vld [vmem:[#allocation2 + $0x3a8] sm:$0xff]  }
  0x8a   :  { %2587 = vmatprep.subr.bf16.mxu1 %v2889_v15  ;;  %v2937_v15 = vld [vmem:[#allocation2 + $0x3e0] sm:$0xff]  }
  0x8b   :  { %2566 = vmatpush3.bf16.msra.mxu0 %v2888_v16  ;;  %v2936_v16 = vld [vmem:[#allocation2 + $0x320] sm:$0xff]  }
  0x8c   :  { %2595 = vmatprep.subr.bf16.mxu0 %v2891_v18  ;;  %v2938_v18 = vld [vmem:[#allocation2 + $0x3a0] sm:$0xff]  }
  0x8d   :  { %2588 = vmatpush3.bf16.msra.mxu1 %v2890_v19  ;;  %v2941_v19 = vld [vmem:[#allocation2 + $0x3d8] sm:$0xff]  }
  0x8e   :  { %1732 = vmatmul.mubr.bf16.vlgmr.msra.gmra.mxu0 %v483_v17  ;;  %2617 = vmatprep.subr.bf16.mxu1 %v2893_v20  ;;  %v2939_v17 = vld [vmem:[#allocation2 + $0x358] sm:$0xff]  }
  0x8f   :  { %2596 = vmatpush3.bf16.msra.mxu0 %v2892_v21  ;;  %1811 = vmatprep.mubr.bf16.mxu0 %v539_v62  ;;  %v2940_v20 = vld [vmem:[#allocation2 + $0x318] sm:$0xff]   ;;  %v2943_v21 = vld [vmem:[#allocation2 + $0x350] sm:$0xff]  }
  0x90   :  { %1772 = vmatmul.mubr.bf16.vlgmr.msra.gmra.mxu1 %v499_v22  ;;  %2597 = vmatprep.subr.bf16.mxu0 %v2895_v24  ;;  %v2942_v22 = vld [vmem:[#allocation2 + $0x398] sm:$0xff]   ;;  %v2945_v24 = vld [vmem:[#allocation2 + $0x3d0] sm:$0xff]  }
  0x91   :  { %2618 = vmatpush3.bf16.msra.mxu1 %v2894_v25  ;;  %1851 = vmatprep.mubr.bf16.mxu1 %v549_v3  ;;  %v2944_v25 = vld [vmem:[#allocation2 + $0x310] sm:$0xff]   ;;  %v2986_v3 = vld [vmem:[#allocation2 + $0x4c0] sm:$0xff]  }
  0x92   :  { %2619 = vmatprep.subr.bf16.mxu1 %v2897_v26  ;;  %v2947_v26 = vld [vmem:[#allocation2 + $0x348] sm:$0xff]   ;;  %v2979_v62 = vld [vmem:[#allocation2 + $0x490] sm:$0xff]  }
  0x93   :  { %2598 = vmatpush3.bf16.msra.mxu0 %v2896_v27  ;;  %v2946_v27 = vld [vmem:[#allocation2 + $0x390] sm:$0xff]  }
  0x94   :  { %2599 = vmatprep.subr.bf16.mxu0 %v2899_v28  ;;  %v2949_v28 = vld [vmem:[#allocation2 + $0x3c8] sm:$0xff]  }
  0x95   :  { %2620 = vmatpush3.bf16.msra.mxu1 %v2898_v29  ;;  %v2948_v29 = vld [vmem:[#allocation2 + $0x308] sm:$0xff]  }
  0x96   :  { %2621 = vmatprep.subr.bf16.mxu1 %v2901_v30  ;;  %v2951_v30 = vld [vmem:[#allocation2 + $0x340] sm:$0xff]  }
  0x97   :  { %2600 = vmatpush3.bf16.msra.mxu0 %v2900_v31  ;;  %v2950_v31 = vld [vmem:[#allocation2 + $0x388] sm:$0xff]  }
  0x98   :  { %2601 = vmatprep.subr.bf16.mxu0 %v2903_v32  ;;  %v2953_v32 = vld [vmem:[#allocation2 + $0x3c0] sm:$0xff]  }
  0x99   :  { %2622 = vmatpush3.bf16.msra.mxu1 %v2902_v33  ;;  %v2952_v33 = vld [vmem:[#allocation2 + $0x300] sm:$0xff]  }
  0x9a   :  { %2623 = vmatprep.subr.bf16.mxu1 %v2905_v35  ;;  %v532_v35 = vrot.slane %v3260_v60, %v3238_v34  ;;  %v2977_v60 = vld [vmem:[#allocation2 + $0x410] sm:$0xff]  }
  0x9b   :  { %2602 = vmatpush3.bf16.msra.mxu0 %v2904_v36  ;;  %v2956_v36 = vld [vmem:[#allocation2 + $0x478] sm:$0xff]  }
  0x9c   :  { %2603 = vmatprep.subr.bf16.mxu0 %v2907_v37  ;;  %v2955_v37 = vld [vmem:[#allocation2 + $0x380] sm:$0xff]  }
  0x9d   :  { %2624 = vmatpush3.bf16.msra.mxu1 %v2906_v38  ;;  %v2958_v38 = vld [vmem:[#allocation2 + $0x4f8] sm:$0xff]  }
  0x9e   :  { %2625 = vmatprep.subr.bf16.mxu1 %v2909_v39  ;;  %v2957_v39 = vld [vmem:[#allocation2 + $0x438] sm:$0xff]  }
  0x9f   :  { %2604 = vmatpush3.bf16.msra.mxu0 %v2908_v40  ;;  %v548_v40 = vcombine.high %v532_v35, %v532_v35 }
  0xa0   :  { %2605 = vmatprep.subr.bf16.mxu0 %v2911_v41  ;;  %v2960_v41 = vld [vmem:[#allocation2 + $0x470] sm:$0xff]  }
  0xa1   :  { %2626 = vmatpush3.bf16.msra.mxu1 %v2910_v42  ;;  %v2959_v42 = vld [vmem:[#allocation2 + $0x4b8] sm:$0xff]  }
  0xa2   :  { %2627 = vmatprep.subr.bf16.mxu1 %v2913_v43  ;;  %v2962_v43 = vld [vmem:[#allocation2 + $0x4f0] sm:$0xff]  }
  0xa3   :  { %2606 = vmatpush3.bf16.msra.mxu0 %v2912_v44  ;;  %v2961_v44 = vld [vmem:[#allocation2 + $0x430] sm:$0xff]  }
  0xa4   :  { %2607 = vmatprep.subr.bf16.mxu0 %v2915_v45  ;;  %v2964_v45 = vld [vmem:[#allocation2 + $0x468] sm:$0xff]  }
  0xa5   :  { %2628 = vmatpush3.bf16.msra.mxu1 %v2914_v46  ;;  %v2963_v46 = vld [vmem:[#allocation2 + $0x4b0] sm:$0xff]  }
  0xa6   :  { %2629 = vmatprep.subr.bf16.mxu1 %v2917_v47  ;;  %v2966_v47 = vld [vmem:[#allocation2 + $0x4e8] sm:$0xff]  }
  0xa7   :  { %2608 = vmatpush3.bf16.msra.mxu0 %v2916_v48  ;;  %v2965_v48 = vld [vmem:[#allocation2 + $0x428] sm:$0xff]  }
  0xa8   :  { %2609 = vmatprep.subr.bf16.mxu0 %v2919_v49  ;;  %v2968_v49 = vld [vmem:[#allocation2 + $0x460] sm:$0xff]  }
  0xa9   :  { %2630 = vmatpush3.bf16.msra.mxu1 %v2918_v50  ;;  %v2967_v50 = vld [vmem:[#allocation2 + $0x4a8] sm:$0xff]  }
  0xaa   :  { %2631 = vmatprep.subr.bf16.mxu1 %v2921_v51  ;;  %v2970_v51 = vld [vmem:[#allocation2 + $0x4e0] sm:$0xff]  }
  0xab   :  { %2610 = vmatpush3.bf16.msra.mxu0 %v2920_v53  ;;  %v2972_v53 = vld [vmem:[#allocation2 + $0x458] sm:$0xff]  }
  0xac   :  { %2639 = vmatprep.subr.bf16.mxu0 %v2923_v56  ;;  %v2973_v56 = vld [vmem:[#allocation2 + $0x418] sm:$0xff]  }
  0xad   :  { %2632 = vmatpush3.bf16.msra.mxu1 %v2922_v58  ;;  %v2975_v58 = vld [vmem:[#allocation2 + $0x498] sm:$0xff]  }
  0xae   :  { %1812 = vmatmul.mubr.bf16.vlgmr.msra.gmra.mxu0 %v525_v59  ;;  %2661 = vmatprep.subr.bf16.mxu1 %v2925_v61  ;;  %v2978_v59 = vld [vmem:[#allocation2 + $0x4d0] sm:$0xff]   ;;  %v2980_v61 = vld [vmem:[#allocation2 + $0x448] sm:$0xff]  }
  0xaf   :  { %2640 = vmatpush3.bf16.msra.mxu0 %v2924_v63  ;;  %1891 = vmatprep.mubr.bf16.mxu0 %v546_v5  ;;  %v2982_v63 = vld [vmem:[#allocation2 + $0x4c8] sm:$0xff]   ;;  %v2985_v5 = vld [vmem:[#allocation2 + $0x400] sm:$0xff]  }
  0xb0   :  { %1852 = vmatmul.mubr.bf16.vlgmr.msra.gmra.mxu1 %v547_v1  ;;  %2641 = vmatprep.subr.bf16.mxu0 %v2927_v2  ;;  %v2984_v1 = vld [vmem:[#allocation2 + $0x440] sm:$0xff]   ;;  %v2983_v2 = vld [vmem:[#allocation2 + $0x488] sm:$0xff]  }
  0xb1   :  { %2662 = vmatpush3.bf16.msra.mxu1 %v2926_v4  ;;  %1931 = vmatprep.mubr.bf16.mxu1 %v550_v8  ;;  %v106_v4 = vld [vmem:[%s3310_s0 + $0x10] sm:$0x1f]  ;;  %v2988_v8 = vld [vmem:[#allocation2 + $0x480] sm:$0xff]   ;;  %s3178_s0 = smov [#allocation13]  }
  0xb2   :  { %2663 = vmatprep.subr.bf16.mxu1 %v2929_v6  ;;  %v558_v6 = vrot.slane %v106_v4, %v3238_v34  ;;  %s2308_s13 = sshll.u32 %s3178_s0, 4  ;;  %s2309_s13 = int_to_ptr.vmem [resolvable:$true] %s2308_s13 }
  0xb3   :  { %2642 = vmatpush3.bf16.msra.mxu0 %v2928_v7  ;;  %s3137_s14 = scalar_lea.vmem %s2309_s13, 32  ;;  %p3142_p3 = scmp.lt.s32.totalorder %s2309_s13, %s2309_s13 }
  0xb4   :  { %2643 = vmatprep.subr.bf16.mxu0 %v2931_v9  ;;  %v566_v7 = vcombine.high %v558_v6, %v558_v6  ;;  %v573_v9 = vrot.slane %v558_v6, %v3238_v34  ;;  %p3138_p2 = scmp.ne.s32.totalorder %s2309_s13, %s3137_s14  ;;  %p3143_p4 = scmp.lt.s32.totalorder %s3137_s14, %s3137_s14 }
  0xb5   :  { %2664 = vmatpush3.bf16.msra.mxu1 %v2930_v10 }
  0xb6   :  { %2665 = vmatprep.subr.bf16.mxu1 %v2933_v11  ;;  %v587_v10 = vrot.slane %v566_v7, %v3238_v34  ;;  %v2989_v11 = vld [vmem:[#allocation2 + $0x538] sm:$0xff]   ;;  %p3144_p5 = por %p3143_p4, %p3142_p3 }
  0xb7   :  { %2644 = vmatpush3.bf16.msra.mxu0 %v2932_v12  ;;  %v3176_v12 = vmov 0.0  }
  0xb8   :  { %2645 = vmatprep.subr.bf16.mxu0 %v2935_v13  ;;  %v588_v13 = vcombine.high %v573_v9, %v573_v9  ;;  %p3145_p6 = pnand %p3144_p5, %p3138_p2 }
  0xb9   :  { %2666 = vmatpush3.bf16.msra.mxu1 %v2934_v14  ;;  %v589_v14 = vcombine.high %v587_v10, %v587_v10 }
  0xba   :  { %2667 = vmatprep.subr.bf16.mxu1 %v2937_v15  ;;  %v2990_v15 = vld [vmem:[#allocation2 + $0x530] sm:$0xff]  }
  0xbb   :  { %2646 = vmatpush3.bf16.msra.mxu0 %v2936_v16  ;;  %v2991_v16 = vld [vmem:[#allocation2 + $0x528] sm:$0xff]  }
  0xbc   :  { %2647 = vmatprep.subr.bf16.mxu0 %v2939_v17  ;;  %v2992_v17 = vld [vmem:[#allocation2 + $0x520] sm:$0xff]  }
  0xbd   :  { %2668 = vmatpush3.bf16.msra.mxu1 %v2938_v18  ;;  %v2993_v18 = vld [vmem:[#allocation2 + $0x518] sm:$0xff]  }
  0xbe   :  { %2669 = vmatprep.subr.bf16.mxu1 %v2941_v19  ;;  %v2994_v19 = vld [vmem:[#allocation2 + $0x510] sm:$0xff]  }
  0xbf   :  { %2648 = vmatpush3.bf16.msra.mxu0 %v2940_v20  ;;  %v551_v20 = vcombine.high %v106_v4, %v106_v4 }
  0xc0   :  { %2649 = vmatprep.subr.bf16.mxu0 %v2943_v21  ;;  %v2995_v21 = vld [vmem:[#allocation2 + $0x508] sm:$0xff]  }
  0xc1   :  { %2670 = vmatpush3.bf16.msra.mxu1 %v2942_v22  ;;  %v565_v22 = vrot.slane %v551_v20, %v3238_v34 }
  0xc2   :  { %2671 = vmatprep.subr.bf16.mxu1 %v2945_v24  ;;  %v2996_v24 = vld [vmem:[#allocation2 + $0x500] sm:$0xff]  }
  0xc3   :  { %2650 = vmatpush3.bf16.msra.mxu0 %v2944_v25  ;;  %v580_v25 = vrot.slane %v565_v22, %v3238_v34 }
  0xc4   :  { %2651 = vmatprep.subr.bf16.mxu0 %v2947_v26 }
  0xc5   :  { %2672 = vmatpush3.bf16.msra.mxu1 %v2946_v27  ;;  %v2320_v27 = vld [vmem:[#allocation5] ss:$0 sm:$0xff] }
  0xc6   :  { %2673 = vmatprep.subr.bf16.mxu1 %v2949_v28 }
  0xc7   :  { %2652 = vmatpush3.bf16.msra.mxu0 %v2948_v29 }
  0xc8   :  { %2653 = vmatprep.subr.bf16.mxu0 %v2951_v30 }
  0xc9   :  { %2674 = vmatpush3.bf16.msra.mxu1 %v2950_v31 }
  0xca   :  { %2675 = vmatprep.subr.bf16.mxu1 %v2953_v32 }
  0xcb   :  { %2654 = vmatpush3.bf16.msra.mxu0 %v2952_v33 }
  0xcc   :  { %2683 = vmatprep.subr.bf16.mxu0 %v2956_v36 }
  0xcd   :  { %2676 = vmatpush3.bf16.msra.mxu1 %v2955_v37 }
  0xce   :  { %1892 = vmatmul.mubr.bf16.vlgmr.msra.gmra.mxu0 %v532_v35  ;;  %2705 = vmatprep.subr.bf16.mxu1 %v2958_v38  ;;  %v2997_v38 = vld [vmem:[#allocation7 + $0x38] sm:$0xff]  }
  0xcf   :  { %2684 = vmatpush3.bf16.msra.mxu0 %v2957_v39  ;;  %1971 = vmatprep.mubr.bf16.mxu0 %v587_v10 }
  0xd0   :  { %1932 = vmatmul.mubr.bf16.vlgmr.msra.gmra.mxu1 %v548_v40  ;;  %2685 = vmatprep.subr.bf16.mxu0 %v2960_v41  ;;  %v2998_v40 = vld [vmem:[#allocation7 + $0x30] sm:$0xff]   ;;  %v2999_v41 = vld [vmem:[#allocation7 + $0x28] sm:$0xff]  }
  0xd1   :  { %2706 = vmatpush3.bf16.msra.mxu1 %v2959_v42  ;;  %2011 = vmatprep.mubr.bf16.mxu1 %v589_v14  ;;  %v3000_v42 = vld [vmem:[#allocation7 + $0x20] sm:$0xff]  }
  0xd2   :  { %2707 = vmatprep.subr.bf16.mxu1 %v2962_v43  ;;  %v3001_v43 = vld [vmem:[#allocation7 + $0x18] sm:$0xff]  }
  0xd3   :  { %2686 = vmatpush3.bf16.msra.mxu0 %v2961_v44  ;;  %v3002_v44 = vld [vmem:[#allocation7 + $0x10] sm:$0xff]  }
  0xd4   :  { %2687 = vmatprep.subr.bf16.mxu0 %v2964_v45  ;;  %v3003_v45 = vld [vmem:[#allocation7 + $0x8] sm:$0xff]  }
  0xd5   :  { %2708 = vmatpush3.bf16.msra.mxu1 %v2963_v46 }
  0xd6   :  { %2709 = vmatprep.subr.bf16.mxu1 %v2966_v47 }
  0xd7   :  { %2688 = vmatpush3.bf16.msra.mxu0 %v2965_v48 }
  0xd8   :  { %2689 = vmatprep.subr.bf16.mxu0 %v2968_v49  ;;  %v3004_v49 = vld [vmem:[#allocation7] sm:$0xff]  }
  0xd9   :  { %2710 = vmatpush3.bf16.msra.mxu1 %v2967_v50 }
  0xda   :  { %2711 = vmatprep.subr.bf16.mxu1 %v2970_v51 }
  0xdb   :  { %2690 = vmatpush3.bf16.msra.mxu0 %v2969_v52 }
  0xdc   :  { %2691 = vmatprep.subr.bf16.mxu0 %v2972_v53 }
  0xdd   :  { %2712 = vmatpush3.bf16.msra.mxu1 %v2971_v54 }
  0xde   :  { %2713 = vmatprep.subr.bf16.mxu1 %v2974_v55 }
  0xdf   :  { %2692 = vmatpush3.bf16.msra.mxu0 %v2973_v56 }
  0xe0   :  { %2693 = vmatprep.subr.bf16.mxu0 %v2976_v57 }
  0xe1   :  { %2714 = vmatpush3.bf16.msra.mxu1 %v2975_v58  ;;  %v3005_v58 = vld [vmem:[#allocation10 + $0x38] sm:$0xff]  }
  0xe2   :  { %2715 = vmatprep.subr.bf16.mxu1 %v2978_v59 }
  0xe3   :  { %2694 = vmatpush3.bf16.msra.mxu0 %v2977_v60  ;;  %v3006_v60 = vld [vmem:[#allocation10 + $0x30] sm:$0xff]  }
  0xe4   :  { %2695 = vmatprep.subr.bf16.mxu0 %v2980_v61  ;;  %v3007_v61 = vld [vmem:[#allocation10 + $0x28] sm:$0xff]  }
  0xe5   :  { %2716 = vmatpush3.bf16.msra.mxu1 %v2979_v62  ;;  %v3008_v62 = vld [vmem:[#allocation10 + $0x20] sm:$0xff]  }
  0xe6   :  { %2717 = vmatprep.subr.bf16.mxu1 %v2982_v63  ;;  %v3009_v63 = vld [vmem:[#allocation10 + $0x18] sm:$0xff]  }
  0xe7   :  { %2696 = vmatpush3.bf16.msra.mxu0 %v2981_v0  ;;  %v3010_v0 = vld [vmem:[#allocation10 + $0x10] sm:$0xff]  }
  0xe8   :  { %2697 = vmatprep.subr.bf16.mxu0 %v2984_v1 }
  0xe9   :  { %2718 = vmatpush3.bf16.msra.mxu1 %v2983_v2 }
  0xea   :  { %2719 = vmatprep.subr.bf16.mxu1 %v2986_v3 }
  0xeb   :  { %2698 = vmatpush3.bf16.msra.mxu0 %v2985_v5 }
  0xec   :  { %2754 = vmatprep.subr.bf16.mxu0 %v3176_v12 }
  0xed   :  { %2720 = vmatpush3.bf16.msra.mxu1 %v2988_v8 }
  0xee   :  { %1972 = vmatmul.mubr.bf16.vlgmr.msra.gmra.mxu0 %v573_v9  ;;  %2774 = vmatprep.subr.bf16.mxu1 %v3176_v12 }
  0xef   :  { %2755 = vmatpush3.bf16.msra.mxu0 %v2989_v11  ;;  %2770 = vmatprep.mubr.msk.bf16.mxu0 %vm3177_vm0, %v3176_v12 }
  0xf0   :  { %2012 = vmatmul.mubr.bf16.vlgmr.msra.gmra.mxu1 %v588_v13  ;;  %2756 = vmatprep.subr.bf16.mxu0 %v3176_v12 }
  0xf1   :  { %2790 = vmatprep.mubr.msk.bf16.mxu1 %vm3177_vm0, %v3176_v12  ;;  %2775 = vmatpush3.bf16.msra.mxu1 %v2997_v38 }
  0xf2   :  { %2776 = vmatprep.subr.bf16.mxu1 %v3176_v12 }
  0xf3   :  { %2757 = vmatpush3.bf16.msra.mxu0 %v2990_v15 }
  0xf4   :  { %2758 = vmatprep.subr.bf16.mxu0 %v3176_v12 }
  0xf5   :  { %2777 = vmatpush3.bf16.msra.mxu1 %v2998_v40 }
  0xf6   :  { %2778 = vmatprep.subr.bf16.mxu1 %v3176_v12 }
  0xf7   :  { %2759 = vmatpush3.bf16.msra.mxu0 %v2991_v16 }
  0xf8   :  { %2760 = vmatprep.subr.bf16.mxu0 %v3176_v12 }
  0xf9   :  { %2779 = vmatpush3.bf16.msra.mxu1 %v2999_v41 }
  0xfa   :  { %2780 = vmatprep.subr.bf16.mxu1 %v3176_v12 }
  0xfb   :  { %2761 = vmatpush3.bf16.msra.mxu0 %v2992_v17 }
  0xfc   :  { %2762 = vmatprep.subr.bf16.mxu0 %v3176_v12 }
  0xfd   :  { %2781 = vmatpush3.bf16.msra.mxu1 %v3000_v42 }
  0xfe   :  { %2782 = vmatprep.subr.bf16.mxu1 %v3176_v12 }
  0xff   :  { %2763 = vmatpush3.bf16.msra.mxu0 %v2993_v18 }
 0x100   :  { %2764 = vmatprep.subr.bf16.mxu0 %v3176_v12 }
 0x101   :  { %2783 = vmatpush3.bf16.msra.mxu1 %v3001_v43 }
 0x102   :  { %2784 = vmatprep.subr.bf16.mxu1 %v3176_v12 }
 0x103   :  { %2765 = vmatpush3.bf16.msra.mxu0 %v2994_v19 }
 0x104   :  { %2766 = vmatprep.subr.bf16.mxu0 %v3176_v12 }
 0x105   :  { %2785 = vmatpush3.bf16.msra.mxu1 %v3002_v44 }
 0x106   :  { %2786 = vmatprep.subr.bf16.mxu1 %v3176_v12 }
 0x107   :  { %2767 = vmatpush3.bf16.msra.mxu0 %v2995_v21 }
 0x108   :  { %2768 = vmatprep.subr.bf16.mxu0 %v3176_v12 }
 0x109   :  { %2787 = vmatpush3.bf16.msra.mxu1 %v3003_v45 }
 0x10a   :  { %2788 = vmatprep.subr.bf16.mxu1 %v3176_v12 }
 0x10b   :  { %2769 = vmatpush3.bf16.msra.mxu0 %v2996_v24 }
 0x10c   :  { %2794 = vmatprep.subr.bf16.mxu0 %v3176_v12 }
 0x10d   :  { %2789 = vmatpush3.bf16.msra.mxu1 %v3004_v49 }
 0x10e   :  { %2771 = vmatmul.mubr.bf16.vlgmr.msra.gmra.mxu0 %v580_v25 }
 0x10f   :  { %2810 = vmatprep.mubr.msk.bf16.mxu0 %vm3177_vm0, %v3176_v12  ;;  %2795 = vmatpush3.bf16.msra.mxu0 %v3005_v58 }
 0x110   :  { %2796 = vmatprep.subr.bf16.mxu0 %v3176_v12 }
 0x113   :  { %2797 = vmatpush3.bf16.msra.mxu0 %v3006_v60 }
 0x114   :  { %2798 = vmatprep.subr.bf16.mxu0 %v3176_v12 }
 0x117   :  { %2799 = vmatpush3.bf16.msra.mxu0 %v3007_v61 }
 0x118   :  { %2800 = vmatprep.subr.bf16.mxu0 %v3176_v12 }
 0x11b   :  { %2801 = vmatpush3.bf16.msra.mxu0 %v3008_v62 }
 0x11c   :  { %2802 = vmatprep.subr.bf16.mxu0 %v3176_v12 }
 0x11f   :  { %2803 = vmatpush3.bf16.msra.mxu0 %v3009_v63 }
 0x120   :  { %2804 = vmatprep.subr.bf16.mxu0 %v3176_v12 }
 0x123   :  { %2805 = vmatpush3.bf16.msra.mxu0 %v3010_v0 }
 0x124   :  { %2806 = vmatprep.subr.bf16.mxu0 %v3176_v12 }
 0x12e   :  { %v2523_v26 = vpop.f32.mrf.mxu0 }
 0x130   :  { %v2524_v28 = vpop.f32.mrf.mxu0  ;;  %v2545_v29 = vpop.f32.mrf.mxu1 }
 0x131   :  { %v2525_v30 = vadd.f32 %v2524_v28, %v2523_v26 }
 0x132   :  { %v2526_v31 = vpop.f32.mrf.mxu0  ;;  %v2546_v32 = vpop.f32.mrf.mxu1 }
 0x133   :  { %v1654_v33 = vadd.f32 %v2525_v30, %v2320_v27  ;;  %v2547_v35 = vadd.f32 %v2546_v32, %v2545_v29 }
 0x134   :  { %v2527_v36 = vpop.f32.mrf.mxu0  ;;  %v2548_v37 = vpop.f32.mrf.mxu1 }
 0x135   :  { %v1694_v34 = vadd.f32 %v2547_v35, %v1654_v33 }
 0x136   :  { %v2549_v39 = vpop.f32.mrf.mxu1 }
 0x14e   :  { %v2567_v46 = vpop.f32.mrf.mxu0 }
 0x150   :  { %v2568_v47 = vpop.f32.mrf.mxu0  ;;  %v2589_v48 = vpop.f32.mrf.mxu1 }
 0x151   :  { %v2569_v50 = vadd.f32 %v2568_v47, %v2567_v46  ;;  %v3011_v46 = vld [vmem:[#allocation10 + $0x8] sm:$0xff]   ;;  %v3012_v47 = vld [vmem:[#allocation10] sm:$0xff]  }
 0x152   :  { %v2570_v51 = vpop.f32.mrf.mxu0  ;;  %v2590_v52 = vpop.f32.mrf.mxu1  ;;  %2807 = vmatpush3.bf16.msra.mxu0 %v3011_v46 }
 0x153   :  { %v1734_v53 = vadd.f32 %v2569_v50, %v1694_v34  ;;  %v2591_v54 = vadd.f32 %v2590_v52, %v2589_v48  ;;  %2808 = vmatprep.subr.bf16.mxu0 %v3176_v12  ;;  %v2489_v48 = vld [vmem:[#allocation8] ss:$0 sm:$0xff] }
 0x154   :  { %v2571_v55 = vpop.f32.mrf.mxu0  ;;  %v2592_v56 = vpop.f32.mrf.mxu1 }
 0x155   :  { %v1774_v57 = vadd.f32 %v2591_v54, %v1734_v53  ;;  %v2286_v56 = vand.u32 127, %v457_v23 }
 0x156   :  { %v2593_v59 = vpop.f32.mrf.mxu1  ;;  %2809 = vmatpush3.bf16.msra.mxu0 %v3012_v47 }
 0x157   :  { %vm2287_vm1 = vcmp.lt.s32.totalorder %v2286_v56, 2 }
 0x16e   :  { %v2611_v1 = vpop.f32.mrf.mxu0 }
 0x170   :  { %v2612_v2 = vpop.f32.mrf.mxu0  ;;  %v2633_v3 = vpop.f32.mrf.mxu1 }
 0x171   :  { %v2613_v4 = vadd.f32 %v2612_v2, %v2611_v1 }
 0x172   :  { %v2614_v5 = vpop.f32.mrf.mxu0  ;;  %v2634_v6 = vpop.f32.mrf.mxu1 }
 0x173   :  { %v1814_v7 = vadd.f32 %v2613_v4, %v1774_v57  ;;  %v2635_v8 = vadd.f32 %v2634_v6, %v2633_v3  ;;  %v2498_v57 = vld [vmem:[#allocation11] ss:$0 sm:$0xff] }
 0x174   :  { %v2615_v9 = vpop.f32.mrf.mxu0  ;;  %v2636_v10 = vpop.f32.mrf.mxu1 }
 0x175   :  { %v1854_v11 = vadd.f32 %v2635_v8, %v1814_v7 }
 0x176   :  { %v2637_v13 = vpop.f32.mrf.mxu1 }
 0x18e   :  { %v2655_v14 = vpop.f32.mrf.mxu0 }
 0x190   :  { %v2656_v15 = vpop.f32.mrf.mxu0  ;;  %v2677_v16 = vpop.f32.mrf.mxu1 }
 0x191   :  { %v2657_v31 = vadd.f32 %v2656_v15, %v2655_v14 }
 0x192   :  { %v2658_v17 = vpop.f32.mrf.mxu0  ;;  %v2678_v18 = vpop.f32.mrf.mxu1 }
 0x193   :  { %v1894_v32 = vadd.f32 %v2657_v31, %v1854_v11  ;;  %v2679_v33 = vadd.f32 %v2678_v18, %v2677_v16 }
 0x194   :  { %v2659_v19 = vpop.f32.mrf.mxu0  ;;  %v2680_v20 = vpop.f32.mrf.mxu1 }
 0x195   :  { %v1934_v36 = vadd.f32 %v2679_v33, %v1894_v32 }
 0x196   :  { %v2681_v21 = vpop.f32.mrf.mxu1 }
 0x1ae   :  { %v2699_v22 = vpop.f32.mrf.mxu0 }
 0x1b0   :  { %v2700_v24 = vpop.f32.mrf.mxu0  ;;  %v2721_v25 = vpop.f32.mrf.mxu1 }
 0x1b1   :  { %v2701_v35 = vadd.f32 %v2700_v24, %v2699_v22 }
 0x1b2   :  { %v2702_v26 = vpop.f32.mrf.mxu0  ;;  %v2722_v27 = vpop.f32.mrf.mxu1 }
 0x1b3   :  { %v1974_v37 = vadd.f32 %v2701_v35, %v1934_v36  ;;  %v2723_v38 = vadd.f32 %v2722_v27, %v2721_v25 }
 0x1b4   :  { %v2703_v28 = vpop.f32.mrf.mxu0  ;;  %v2724_v29 = vpop.f32.mrf.mxu1 }
 0x1b5   :  { %v2014_v34 = vadd.f32 %v2723_v38, %v1974_v37 }
 0x1b6   :  { %v2725_v30 = vpop.f32.mrf.mxu1 }
 0x1ce   :  { %v2053_v39 = vpop.f32.mrf.mxu0 }
 0x1cf   :  { %v2054_v40 = vadd.f32 %v2053_v39, %v2014_v34 }
 0x1d0   :  { %v2772_v41 = vpop.f32.mrf.mxu0 }
 0x1d1   :  { %v2059_v42 = vmax.f32 %v2054_v40, 0.0 }
 0x1d2   :  { %v2056_v43 = vpop.f32.mrf.mxu0 }
 0x1d3   :  { %v2060_v44 = vpack.c.bf16 %v2059_v42, %v2059_v42 }
 0x1d4   :  { %v2773_v45 = vpop.f32.mrf.mxu0 }
 0x1d5   :  { %2791 = vmatmul.mubr.bf16.vlgmr.msra.gmra.mxu1 %v2060_v44 }
 0x295   :  { %v2166_v49 = vpop.f32.mrf.mxu1 }
 0x296   :  { %v2167_v50 = vadd.f32 %v2489_v48, %v2166_v49 }
 0x297   :  { %v2792_v51 = vpop.f32.mrf.mxu1 }
 0x298   :  { %v2172_v52 = vmax.f32 %v2167_v50, 0.0 }
 0x299   :  { %v2169_v53 = vpop.f32.mrf.mxu1 }
 0x29a   :  { %v2173_v54 = vpack.c.bf16 %v2172_v52, %v2172_v52 }
 0x29b   :  { %v2793_v55 = vpop.f32.mrf.mxu1 }
 0x29c   :  { %2811 = vmatmul.mubr.bf16.vlgmr.msra.gmra.mxu0 %v2173_v54 }
 0x35c   :  { %v2279_v58 = vpop.f32.mrf.mxu0 }
 0x35d   :  { %v2280_v59 = vadd.f32 %v2498_v57, %v2279_v58 }
 0x35e   :  { %v2812_v60 = vpop.f32.mrf.mxu0 }
 0x35f   :  { %v2288_v12 = vsel %vm2287_vm1, %v2280_v59, -1e+30 }
 0x360   :  { %v2282_v61 = vpop.f32.mrf.mxu0  ;;  %v2290_v62 = vsel %vm2289_vm2, %v2288_v12, -inf }
 0x361   :  { %2291 = vmax.xlane.f32.xlu0 %v2290_v62 }
 0x362   :  { %v2813_v63 = vpop.f32.mrf.mxu0 }
 0x3ea   :  { %v2292_v0 = vpop.xlane.xlu0 %2291 }
 0x3eb   :  { %v2293_v1 = vsub.f32 %v2288_v12, %v2292_v0 }
 0x3ed   :  { %v2294_v2 = vmul.f32 1.442695, %v2293_v1 }
 0x3ef   :  { %3013 = vpow2.f32 %v2294_v2 }
 0x3fc   :  { %v3014_v3 = vpop.eup %3013 }
 0x3fd   :  { %v2296_v4 = vsel %vm2289_vm2, %v3014_v3, 0.0 }
 0x3fe   :  { %2297 = vadd.xlane.f32.xlu0 %v2296_v4 }
 0x487   :  { %v2298_v5 = vpop.xlane.xlu0 %2297 }
 0x488   :  { %3015 = vrcp.f32 %v2298_v5 }
 0x495   :  { %v3016_v23 = vpop.eup %3015 }
 0x496   :  { %v2300_v6 = vmul.f32 %v3016_v23, %v3014_v3 }
 0x498   :  { %2301 = vst [vmem:[#allocation13] sm:$0x3] %v2300_v6 }
 0x499   :  { %3148 = shalt.err (!%p3145_p6)
}
 0x49a   :  { %2311 = dma.vmem_to_hbm [thread:$0]  %s2309_s13, 32, %s3317_s7, [#allocation4]  }
 0x49b   :  { %3165 = dma.done.wait [#allocation4], 32  }
 0x49c   :  { %3166 = vsyncadd [#allocation4], 4294967264 }
 0x49d   :  { %2315 = vsyncpa [#allocation3], 1 }
 0x49e   :  { %2316 = vsyncpa [#allocation6], 1 }
 0x49f   :  { %2317 = vsyncpa [#allocation9], 1 }
 0x4a0   :  { %2318 = vsyncpa [#allocation12], 1 }
 0x4a1   :  { %2319 = vsyncpa [#allocation4], 1 }

</bundles_post_ra>
